<compile_context>
chip_gen: v7x
topology: tpu7x:2x2x1
jax: 0.10.0
libtpu: 0.0.40
codegen_flags: <defaults>
</compile_context>

<pallas_src>
import functools

import jax
import jax.numpy as jnp
from jax.experimental import pallas as pl
from jax.experimental.pallas import tpu as pltpu


def _round_up(v, m):
    return ((v + m - 1) // m) * m


# ---------------------------------------------------------------------------
# Fused forward kernel
# ---------------------------------------------------------------------------
def _fused_resconv_kernel(asel_ref,                               # scalar prefetch
                          a_ref, x0_ref, wl_ref, wr_ref, b_ref,   # inputs
                          o_ref,                                  # output
                          xbuf,                                   # VMEM scratch (2*n_pad, f_pad) bf16
                          *, bm, n_pad):
    del asel_ref  # only used inside the adjacency index_map
    l = pl.program_id(0)            # layer index      (serial)
    i = pl.program_id(1)            # node row tile    (serial, shares xbuf)
    nl = pl.num_programs(0)

    # Seed the ping-pong buffer with the padded bf16 input features, once.
    @pl.when((l == 0) & (i == 0))
    def _seed():
        xbuf[pl.ds(0, n_pad), :] = x0_ref[...]

    cur = l % 2                                        # slot holding layer-l input
    prev0 = pl.multiple_of(cur * n_pad, bm)            # all rows of h_in
    row0 = pl.multiple_of(cur * n_pad + i * bm, bm)    # this row tile of h_in
    nxt0 = pl.multiple_of((1 - cur) * n_pad + i * bm, bm)

    h_all = xbuf[pl.ds(prev0, n_pad), :]               # [n_pad, f_pad] bf16
    h_row = xbuf[pl.ds(row0, bm), :]                   # [bm,    f_pad] bf16

    # Aggregation: A_l[row_tile, :] @ h_in   (MXU, f32 accumulation)
    agg = jnp.dot(a_ref[0], h_all, preferred_element_type=jnp.float32)

    z = (jnp.dot(agg.astype(jnp.bfloat16), wl_ref[0],
                 preferred_element_type=jnp.float32)
         + jnp.dot(h_row, wr_ref[0], preferred_element_type=jnp.float32)
         + b_ref[0])

    # ReLU after every layer except the last one.
    # TODO(synk): training-mode dropout (pltpu.prng_seed / prng_random_bits)
    # not implemented; this is the inference path (dropout == identity).
    z = jnp.where(l < nl - 1, jnp.maximum(z, 0.0), z)

    xbuf[pl.ds(nxt0, bm), :] = z.astype(xbuf.dtype)    # feed the next layer
    o_ref[...] = z.astype(o_ref.dtype)                 # last layer's write wins


# ---------------------------------------------------------------------------
# pallas_call wrapper
# ---------------------------------------------------------------------------
def fused_resconv(x, a_gcn, a_mean, wl_stack, wr_stack, b_stack, asel,
                  num_nodes, out_dim):
    num_layers, f_pad, _ = wl_stack.shape
    n8 = _round_up(num_nodes, 8)
    bm = n8 if n8 <= 256 else 256          # row tile (128/256-aligned at scale)
    n_pad = _round_up(n8, bm)
    n_tiles = n_pad // bm

    # Zero-pad nodes (sublanes) and features (lanes).  Padded adjacency
    # columns are zero, so padded rows never pollute real rows.
    x_pad = jnp.zeros((n_pad, f_pad), jnp.float32).at[:num_nodes, :x.shape[1]].set(x)
    a_stack = jnp.zeros((2, n_pad, n_pad), jnp.float32)
    a_stack = a_stack.at[0, :num_nodes, :num_nodes].set(a_gcn)
    a_stack = a_stack.at[1, :num_nodes, :num_nodes].set(a_mean)

    x_bf = x_pad.astype(jnp.bfloat16)
    a_bf = a_stack.astype(jnp.bfloat16)

    flops = int(num_layers * (2 * n_pad * n_pad * f_pad            # A @ X
                              + 4 * n_pad * f_pad * f_pad))        # (.)@Wl + X@Wr
    bytes_accessed = int(num_layers * n_pad * n_pad * 2            # adjacency tiles
                         + num_layers * (2 * f_pad * f_pad * 2 + f_pad * 4)
                         + n_pad * f_pad * 2                       # input features
                         + num_layers * n_pad * f_pad * 4)         # output writebacks

    grid_spec = pltpu.PrefetchScalarGridSpec(
        num_scalar_prefetch=1,                      # asel: per-layer adjacency selector
        grid=(num_layers, n_tiles),
        in_specs=[
            # adjacency row tile, operator chosen per layer via scalar prefetch
            pl.BlockSpec((1, bm, n_pad), lambda l, i, sel: (sel[l], i, 0)),
            # initial features: full block, resident (DMA'd once)
            pl.BlockSpec((n_pad, f_pad), lambda l, i, sel: (0, 0)),
            # per-layer weights / bias (re-fetched only when l changes)
            pl.BlockSpec((1, f_pad, f_pad), lambda l, i, sel: (l, 0, 0)),
            pl.BlockSpec((1, f_pad, f_pad), lambda l, i, sel: (l, 0, 0)),
            pl.BlockSpec((1, 1, f_pad), lambda l, i, sel: (l, 0, 0)),
        ],
        out_specs=pl.BlockSpec((bm, f_pad), lambda l, i, sel: (i, 0)),
        scratch_shapes=[pltpu.VMEM((2 * n_pad, f_pad), jnp.bfloat16)],
    )

    out = pl.pallas_call(
        functools.partial(_fused_resconv_kernel, bm=bm, n_pad=n_pad),
        grid_spec=grid_spec,
        out_shape=jax.ShapeDtypeStruct((n_pad, f_pad), jnp.float32),
        compiler_params=pltpu.CompilerParams(
            dimension_semantics=("arbitrary", "arbitrary"),
            vmem_limit_bytes=32 * 1024 * 1024,      # safe on v5e/v6e/v7x budgets
        ),
        cost_estimate=pl.CostEstimate(flops=flops, transcendentals=0,
                                      bytes_accessed=bytes_accessed),
    )(asel, a_bf, x_bf, wl_stack, wr_stack, b_stack)

    return out[:num_nodes, :out_dim]


# ---------------------------------------------------------------------------
# plain-JAX glue: graph operators, parameters, weight folding, f32 reference
# ---------------------------------------------------------------------------
def build_operators(edge_index, num_nodes):
    """edge_index[0]=source, edge_index[1]=target (PyG convention, j -> i)."""
    src, dst = edge_index[0], edge_index[1]
    a = jnp.zeros((num_nodes, num_nodes), jnp.float32).at[dst, src].add(1.0)
    # GCNConv normalization: D^{-1/2} (A + I) D^{-1/2}
    a_hat = a + jnp.eye(num_nodes, dtype=jnp.float32)
    deg = a_hat.sum(axis=1)
    dinv = jnp.where(deg > 0, jax.lax.rsqrt(deg), 0.0)
    a_gcn = dinv[:, None] * a_hat * dinv[None, :]
    # SAGEConv mean aggregation: row-normalized adjacency (no self loops)
    deg_in = a.sum(axis=1)
    a_mean = a / jnp.maximum(deg_in, 1.0)[:, None]
    return a_gcn, a_mean


def init_params(key, in_dim, hidden_dim, out_dim, num_layers):
    def dense(k, fan_in, fan_out):
        kw, kb = jax.random.split(k)
        lim = 1.0 / jnp.sqrt(jnp.float32(fan_in))
        w = jax.random.uniform(kw, (fan_in, fan_out), jnp.float32, -lim, lim)
        b = jax.random.uniform(kb, (1, fan_out), jnp.float32, -lim, lim)
        return w, b

    keys = jax.random.split(key, 4 + 2 * (num_layers - 2))
    p = {"sage_wl": [], "sage_wr": [], "sage_b": []}
    p["gcn0_w"], p["gcn0_b"] = dense(keys[0], in_dim, hidden_dim)      # GCNConv(in, hidden)
    for li in range(num_layers - 2):                                   # SAGEConv(hidden, hidden)
        wl, b = dense(keys[1 + 2 * li], hidden_dim, hidden_dim)        # lin_l (bias)
        wr, _ = dense(keys[2 + 2 * li], hidden_dim, hidden_dim)        # lin_r (no bias)
        p["sage_wl"].append(wl); p["sage_wr"].append(wr); p["sage_b"].append(b)
    p["lin_w"], p["lin_b"] = dense(keys[-2], hidden_dim, out_dim)      # lin_resGCN
    p["gcnL_w"], p["gcnL_b"] = dense(keys[-1], out_dim, out_dim)       # GCNConv(out, out)
    return p


def _pad2(w, rows, cols):
    return jnp.zeros((rows, cols), jnp.float32).at[:w.shape[0], :w.shape[1]].set(w)


def build_fused_params(params, num_layers, hidden_dim, f_pad):
    """Per-layer (Wl, Wr, b, A-selector) with residual + lin_resGCN folded in."""
    eye_h = jnp.eye(hidden_dim, dtype=jnp.float32)
    wls, wrs, bs, asel = [], [], [], []
    for l in range(num_layers):
        if l == 0:
            wl, wr, b, sel = params["gcn0_w"], None, params["gcn0_b"], 0
        elif l == num_layers - 1:
            wl, wr, b, sel = params["gcnL_w"], None, params["gcnL_b"], 0
        else:
            li = l - 1
            wl = params["sage_wl"][li]
            wr = params["sage_wr"][li] + eye_h         # "+ residual" folded into Wr
            b = params["sage_b"][li]
            sel = 1
        if l == num_layers - 2:                        # fold lin_resGCN (applied pre-ReLU)
            wl = wl @ params["lin_w"]
            wr = None if wr is None else wr @ params["lin_w"]
            b = b @ params["lin_w"] + params["lin_b"]
        wls.append(_pad2(wl, f_pad, f_pad))
        wrs.append(_pad2(wr, f_pad, f_pad) if wr is not None
                   else jnp.zeros((f_pad, f_pad), jnp.float32))
        bs.append(_pad2(b, 1, f_pad))
        asel.append(sel)
    return (jnp.stack(wls).astype(jnp.bfloat16),
            jnp.stack(wrs).astype(jnp.bfloat16),
            jnp.stack(bs),                              # f32 bias (L, 1, f_pad)
            jnp.array(asel, jnp.int32))


def reference_forward(x, a_gcn, a_mean, params, num_layers):
    """Pure-JAX f32 reference mirroring the original PyTorch forward."""
    h = x
    for i in range(num_layers):
        if i == 0:
            h = (a_gcn @ h) @ params["gcn0_w"] + params["gcn0_b"]
        elif i == num_layers - 1:
            h = (a_gcn @ h) @ params["gcnL_w"] + params["gcnL_b"]
        else:
            li = i - 1
            h = ((a_mean @ h) @ params["sage_wl"][li]
                 + h @ params["sage_wr"][li] + params["sage_b"][li] + h)
        if i == num_layers - 2:
            h = h @ params["lin_w"] + params["lin_b"]
        if i < num_layers - 1:
            h = jnp.maximum(h, 0.0)   # dropout is identity at inference
    return h


if __name__ == "__main__":
    num_nodes, num_edges = 16, 40
    in_dim, hidden_dim, out_dim, num_layers = 8, 32, 8, 4

    key = jax.random.PRNGKey(0)
    kx, ke, kp = jax.random.split(key, 3)
    x = jax.random.normal(kx, (num_nodes, in_dim), jnp.float32)
    edge_index = jax.random.randint(ke, (2, num_edges), 0, num_nodes, jnp.int32)

    a_gcn, a_mean = build_operators(edge_index, num_nodes)
    params = init_params(kp, in_dim, hidden_dim, out_dim, num_layers)

    f_pad = _round_up(max(in_dim, hidden_dim, out_dim), 128)   # lane-dense (128) features
    wl_stack, wr_stack, b_stack, asel = build_fused_params(
        params, num_layers, hidden_dim, f_pad)

    out = fused_resconv(x, a_gcn, a_mean, wl_stack, wr_stack, b_stack, asel,
                        num_nodes, out_dim)
    out = jax.block_until_ready(out)

    ref = reference_forward(x, a_gcn, a_mean, params, num_layers)
    assert out.shape == (num_nodes, out_dim) and out.dtype == jnp.float32
    assert bool(jnp.isfinite(out).all())
    # bf16 operands with f32 accumulation: loose tolerance vs. the f32 reference
    assert bool(jnp.allclose(out, ref, atol=1e-1, rtol=1e-1))
    print("KERNEL_OK")
</pallas_src>

<mosaic_0001>
module attributes {stable_mosaic.version = 11 : i64} {
  func.func @_fused_resconv_kernel(%arg0: i32, %arg1: i32, %arg2: memref<4xi32, #tpu.memory_space<smem>>, %arg3: memref<1x16x16xbf16, #tpu.memory_space<vmem>>, %arg4: memref<16x128xbf16, #tpu.memory_space<vmem>>, %arg5: memref<1x128x128xbf16, #tpu.memory_space<vmem>>, %arg6: memref<1x128x128xbf16, #tpu.memory_space<vmem>>, %arg7: memref<1x1x128xf32, #tpu.memory_space<vmem>>, %arg8: memref<16x128xf32, #tpu.memory_space<vmem>>, %arg9: memref<32x128xbf16, #tpu.memory_space<vmem>>) attributes {dimension_semantics = [#tpu.dimension_semantics<arbitrary>, #tpu.dimension_semantics<arbitrary>], iteration_bounds = array<i64: 4, 1>, scalar_prefetch = 1 : i64, scratch_operands = 1 : i64, tpu.core_type = #tpu.core_type<tc>, window_params = [{transform_indices = @transform_0, window_bounds = array<i64: 1, 16, 16>}, {pipeline_mode = #tpu.pipeline_mode<synchronous>, transform_indices = @transform_1, window_bounds = array<i64: 16, 128>}, {transform_indices = @transform_2, window_bounds = array<i64: 1, 128, 128>}, {transform_indices = @transform_3, window_bounds = array<i64: 1, 128, 128>}, {transform_indices = @transform_4, window_bounds = array<i64: 1, 1, 128>}, {transform_indices = @transform_5, window_bounds = array<i64: 16, 128>}]} {
    %c0_i32 = arith.constant 0 : i32
    %0 = arith.cmpi eq, %arg0, %c0_i32 : i32
    %c0_i32_0 = arith.constant 0 : i32
    %1 = arith.cmpi eq, %arg1, %c0_i32_0 : i32
    %2 = arith.andi %0, %1 : i1
    %3 = arith.extui %2 : i1 to i32
    %c0_i32_1 = arith.constant 0 : i32
    %4 = arith.cmpi ne, %3, %c0_i32_1 : i32
    scf.if %4 {
      %c0_30 = arith.constant 0 : index
      %c0_31 = arith.constant 0 : index
      %53 = vector.load %arg4[%c0_30, %c0_31] : memref<16x128xbf16, #tpu.memory_space<vmem>>, vector<16x128xbf16>
      %c0_32 = arith.constant 0 : index
      %c0_33 = arith.constant 0 : index
      %54 = vector.load %arg9[%c0_32, %c0_33] : memref<32x128xbf16, #tpu.memory_space<vmem>>, vector<16x128xbf16>
      tpu.vector_store %arg9[%c0_32, %c0_33], %53 {strides = array<i32>} : memref<32x128xbf16, #tpu.memory_space<vmem>>, vector<16x128xbf16>,
    } else {
    }
    %c2_i32 = arith.constant 2 : i32
    %c0_i32_2 = arith.constant 0 : i32
    %5 = arith.cmpi eq, %c2_i32, %c0_i32_2 : i32
    %c1_i32 = arith.constant 1 : i32
    %6 = arith.select %5, %c1_i32, %c2_i32 : i32
    %7 = arith.remsi %arg0, %6 : i32
    %c0_i32_3 = arith.constant 0 : i32
    %8 = arith.cmpi ne, %7, %c0_i32_3 : i32
    %c0_i32_4 = arith.constant 0 : i32
    %9 = arith.cmpi slt, %7, %c0_i32_4 : i32
    %c0_i32_5 = arith.constant 0 : i32
    %10 = arith.cmpi slt, %6, %c0_i32_5 : i32
    %11 = arith.xori %9, %10 : i1
    %12 = arith.andi %11, %8 : i1
    %13 = arith.addi %7, %6 : i32
    %14 = arith.select %12, %13, %7 : i32
    %c16_i32 = arith.constant 16 : i32
    %15 = arith.muli %14, %c16_i32 : i32
    %16 = tpu.assume_multiple %15, 16 : i32
    %c16_i32_6 = arith.constant 16 : i32
    %17 = arith.muli %14, %c16_i32_6 : i32
    %c16_i32_7 = arith.constant 16 : i32
    %18 = arith.muli %arg1, %c16_i32_7 : i32
    %19 = arith.addi %17, %18 : i32
    %20 = tpu.assume_multiple %19, 16 : i32
    %c1_i32_8 = arith.constant 1 : i32
    %21 = arith.subi %c1_i32_8, %14 : i32
    %c16_i32_9 = arith.constant 16 : i32
    %22 = arith.muli %21, %c16_i32_9 : i32
    %c16_i32_10 = arith.constant 16 : i32
    %23 = arith.muli %arg1, %c16_i32_10 : i32
    %24 = arith.addi %22, %23 : i32
    %25 = tpu.assume_multiple %24, 16 : i32
    %26 = arith.index_cast %16 : i32 to index
    %c0 = arith.constant 0 : index
    %27 = vector.load %arg9[%26, %c0] : memref<32x128xbf16, #tpu.memory_space<vmem>>, vector<16x128xbf16>
    %28 = arith.index_cast %20 : i32 to index
    %c0_11 = arith.constant 0 : index
    %29 = vector.load %arg9[%28, %c0_11] : memref<32x128xbf16, #tpu.memory_space<vmem>>, vector<16x128xbf16>
    %c0_12 = arith.constant 0 : index
    %c0_13 = arith.constant 0 : index
    %c0_14 = arith.constant 0 : index
    %30 = vector.load %arg3[%c0_12, %c0_13, %c0_14] : memref<1x16x16xbf16, #tpu.memory_space<vmem>>, vector<1x16x16xbf16>
    %31 = vector.shape_cast %30 : vector<1x16x16xbf16> to vector<16x16xbf16>
    %cst = arith.constant dense<0.000000e+00> : vector<16x128xf32>
    %32 = tpu.matmul %31, %27, %cst {dimension_numbers = #tpu.dot_dimension_numbers<[1], [0], [0], [1], [0, 0, 1, 1], [], []>} : vector<16x16xbf16>, vector<16x128xbf16>, vector<16x128xf32> -> vector<16x128xf32>
    %33 = arith.truncf %32 : vector<16x128xf32> to vector<16x128xbf16>
    %c0_15 = arith.constant 0 : index
    %c0_16 = arith.constant 0 : index
    %c0_17 = arith.constant 0 : index
    %34 = vector.load %arg5[%c0_15, %c0_16, %c0_17] : memref<1x128x128xbf16, #tpu.memory_space<vmem>>, vector<1x128x128xbf16>
    %35 = vector.shape_cast %34 : vector<1x128x128xbf16> to vector<128x128xbf16>
    %cst_18 = arith.constant dense<0.000000e+00> : vector<16x128xf32>
    %36 = tpu.matmul %33, %35, %cst_18 {dimension_numbers = #tpu.dot_dimension_numbers<[1], [0], [0], [1], [0, 0, 1, 1], [], []>} : vector<16x128xbf16>, vector<128x128xbf16>, vector<16x128xf32> -> vector<16x128xf32>
    %c0_19 = arith.constant 0 : index
    %c0_20 = arith.constant 0 : index
    %c0_21 = arith.constant 0 : index
    %37 = vector.load %arg6[%c0_19, %c0_20, %c0_21] : memref<1x128x128xbf16, #tpu.memory_space<vmem>>, vector<1x128x128xbf16>
    %38 = vector.shape_cast %37 : vector<1x128x128xbf16> to vector<128x128xbf16>
    %cst_22 = arith.constant dense<0.000000e+00> : vector<16x128xf32>
    %39 = tpu.matmul %29, %38, %cst_22 {dimension_numbers = #tpu.dot_dimension_numbers<[1], [0], [0], [1], [0, 0, 1, 1], [], []>} : vector<16x128xbf16>, vector<128x128xbf16>, vector<16x128xf32> -> vector<16x128xf32>
    %40 = arith.addf %36, %39 : vector<16x128xf32>
    %c0_23 = arith.constant 0 : index
    %c0_24 = arith.constant 0 : index
    %c0_25 = arith.constant 0 : index
    %41 = vector.load %arg7[%c0_23, %c0_24, %c0_25] : memref<1x1x128xf32, #tpu.memory_space<vmem>>, vector<1x1x128xf32>
    %42 = vector.shape_cast %41 : vector<1x1x128xf32> to vector<1x128xf32>
    %43 = vector.broadcast %42 : vector<1x128xf32> to vector<16x128xf32>
    %44 = arith.addf %40, %43 : vector<16x128xf32>
    %c3_i32 = arith.constant 3 : i32
    %45 = arith.cmpi slt, %arg0, %c3_i32 : i32
    %cst_26 = arith.constant 0.000000e+00 : f32
    %46 = vector.broadcast %cst_26 : f32 to vector<16x128xf32>
    %47 = arith.maximumf %44, %46 : vector<16x128xf32>
    %48 = arith.select %45, %47, %44 : vector<16x128xf32>
    %49 = arith.truncf %48 : vector<16x128xf32> to vector<16x128xbf16>
    %50 = arith.index_cast %25 : i32 to index
    %c0_27 = arith.constant 0 : index
    %51 = vector.load %arg9[%50, %c0_27] : memref<32x128xbf16, #tpu.memory_space<vmem>>, vector<16x128xbf16>
    tpu.vector_store %arg9[%50, %c0_27], %49 {strides = array<i32>} : memref<32x128xbf16, #tpu.memory_space<vmem>>, vector<16x128xbf16>,
    %c0_28 = arith.constant 0 : index
    %c0_29 = arith.constant 0 : index
    %52 = vector.load %arg8[%c0_28, %c0_29] : memref<16x128xf32, #tpu.memory_space<vmem>>, vector<16x128xf32>
    tpu.vector_store %arg8[%c0_28, %c0_29], %48 {strides = array<i32>} : memref<16x128xf32, #tpu.memory_space<vmem>>, vector<16x128xf32>,
    return
  }
  func.func @transform_0(%arg0: i32, %arg1: i32, %arg2: memref<4xi32, #tpu.memory_space<smem>>) -> (i32, i32, i32) {
    %0 = arith.index_cast %arg0 : i32 to index
    %1 = memref.load %arg2[%0] : memref<4xi32, #tpu.memory_space<smem>>
    %c0_i32 = arith.constant 0 : i32
    %c0_i32_0 = arith.constant 0 : i32
    return %1, %arg1, %c0_i32 : i32, i32, i32
  }
  func.func @transform_1(%arg0: i32, %arg1: i32, %arg2: memref<4xi32, #tpu.memory_space<smem>>) -> (i32, i32) {
    %c0_i32 = arith.constant 0 : i32
    %c0_i32_0 = arith.constant 0 : i32
    %c0_i32_1 = arith.constant 0 : i32
    return %c0_i32, %c0_i32_0 : i32, i32
  }
  func.func @transform_2(%arg0: i32, %arg1: i32, %arg2: memref<4xi32, #tpu.memory_space<smem>>) -> (i32, i32, i32) {
    %c0_i32 = arith.constant 0 : i32
    %c0_i32_0 = arith.constant 0 : i32
    %c0_i32_1 = arith.constant 0 : i32
    return %arg0, %c0_i32, %c0_i32_0 : i32, i32, i32
  }
  func.func @transform_3(%arg0: i32, %arg1: i32, %arg2: memref<4xi32, #tpu.memory_space<smem>>) -> (i32, i32, i32) {
    %c0_i32 = arith.constant 0 : i32
    %c0_i32_0 = arith.constant 0 : i32
    %c0_i32_1 = arith.constant 0 : i32
    return %arg0, %c0_i32, %c0_i32_0 : i32, i32, i32
  }
  func.func @transform_4(%arg0: i32, %arg1: i32, %arg2: memref<4xi32, #tpu.memory_space<smem>>) -> (i32, i32, i32) {
    %c0_i32 = arith.constant 0 : i32
    %c0_i32_0 = arith.constant 0 : i32
    %c0_i32_1 = arith.constant 0 : i32
    return %arg0, %c0_i32, %c0_i32_0 : i32, i32, i32
  }
  func.func @transform_5(%arg0: i32, %arg1: i32, %arg2: memref<4xi32, #tpu.memory_space<smem>>) -> (i32, i32) {
    %c0_i32 = arith.constant 0 : i32
    %c0_i32_0 = arith.constant 0 : i32
    return %arg1, %c0_i32 : i32, i32
  }
}

</mosaic_0001>

<bundles_post_ra>
// kernel: tpu_custom_call.1
= control target key start
LH: loop header
LB: loop body
LE: loop exit
PB: predicated region body
PF: predicated region fallthrough
CT: control target
= control target key end

     0   :  { %s1818_s0 = inlined_call_operand.hbm [shape: s32[4], index: 0, kind: input, shape index: {}]   ;;  %s1819_s1 = inlined_call_operand.hbm [shape: bf16[2,16,16], index: 1, kind: input, shape index: {}]   ;;  %s1820_s2 = inlined_call_operand.hbm [shape: bf16[16,128], index: 2, kind: input, shape index: {}]   ;;  %s1821_s3 = inlined_call_operand.hbm [shape: bf16[4,128,128], index: 3, kind: input, shape index: {}]   ;;  %s1822_s4 = inlined_call_operand.hbm [shape: bf16[4,128,128], index: 4, kind: input, shape index: {}]   ;;  %s1823_s5 = inlined_call_operand.vmem [shape: f32[4,1,128], index: 5, kind: input, shape index: {}]   ;;  %s1824_s6 = inlined_call_operand.hbm [shape: f32[16,128], index: 6, kind: output, shape index: {}]  }
   0x1   :  { %1839 = sst [smem:[#allocation23_spill]] %s1819_s1  ;;  %s1096_s23 = scalar_lea.hbm %s1818_s0, 16 }
   0x2   :  { %1840 = sst [smem:[#allocation24_spill]] %s1821_s3  ;;  %p1097_p0 = scmp.ne.s32.totalorder %s1818_s0, %s1096_s23 }
   0x3   :  { %p1100_p1 = scmp.lt.u32.totalorder %s1096_s23, %s1818_s0 }
   0x5   :  { %p1102_p2 = pnand %p1100_p1, %p1097_p0 }
   0x7   :  { %1105 = shalt.err (!%p1102_p2)  }
   0x8   :  { %s1340_s28 = smov [#allocation4]  }
   0x9   :  { %12 = dma.hbm_to_smem %s1818_s0, 16, %s1340_s28, [#allocation3] }
   0xa   :  { %1286 = dma.done.wait [#allocation3], 16 }
   0xb   :  { %1287 = vsyncadd [#allocation3], 4294967280 }
   0xc   :  { %14 = sfence }
   0xd   :  { %15 = vsyncpa [#allocation6], 0 }
   0xe   :  { %17 = vsyncpa [#allocation6 + $0x1], 0 }
   0xf   :  { %18 = vsyncpa [#allocation9], 0 }
  0x10   :  { %19 = vsyncpa [#allocation7], 0  ;;  %s1399_s7 = smov 0   ;;  %s1401_s8 = smov 0  }
  0x11   :  { %s1403_s9 = smov 0   ;;  %s1405_s10 = smov 0  }
  0x12   :  { %s1407_s11 = smov 0   ;;  %s1409_s12 = smov 0  }
  0x13   :  { %s1411_s0 = smov 0   ;;  %s1413_s13 = smov 0  }
  0x14   :  { %s1415_s14 = smov 0  }
  0x15 LB: > { %1841 = sst [smem:[#allocation20_spill]] %s1326_s12  ;;  %s37_s15 = sadd.s32 1, %s1334_s13  ;;  %s1338_s14 = sphi %s1415_s14, %s25_s14   ;;  %s1334_s13 = sphi %s1413_s13, %s1874_s13   ;;  %s1330_s0 = sphi %s1411_s0, %s1873_s0   ;;  %s1326_s12 = sphi %s1409_s12, %s1866_s12   ;;  %s1322_s11 = sphi %s1407_s11, %s1872_s11   ;;  %s1318_s10 = sphi %s1405_s10, %s1871_s10   ;;  %s1314_s9 = sphi %s1403_s9, %s1870_s9   ;;  %s1310_s8 = sphi %s1401_s8, %s1869_s8   ;;  %s1306_s7 = sphi %s1399_s7, %s1868_s7  }
  0x16   : > { %s41_s16 = sld [smem:[#allocation4 + %s1334_s13]]  ;;  %p39_p3 = scmp.ge.s32.totalorder %s37_s15, 4 }
  0x17   : > { %s48_s17 = sadd.s32 1, %s1326_s12  ;;  %p55_p4 = scmp.ne.s32.totalorder %s1326_s12, %s1322_s11 }
  0x18   : > { %p56_p5 = scmp.eq.s32.totalorder %s1338_s14, 0  ;;  %s1876_s15 = smov (%p39_p3, %s37_s15), 0 }
  0x19   : > { %1842 = sst [smem:[#allocation21_spill]] %s1876_s15  ;;  %p1826_p7 = scmp.lt.s32.totalorder %s1338_s14, 4 }
  0x1a   : > { %p1454_p6 = por %p56_p5, %p55_p4  ;;  %s42_s19 = sld [smem:[#allocation4 + %s1876_s15]] }
  0x1b   : > { %s223_s20 = sand.u32 1, %s1338_s14   ;;  %s225_s21 = sand.u32 1, %s1326_s12  }
  0x1c   : > { %s843_s22 = sshll.u32 %s225_s21, 3  ;;  %p1466_p8 = pnand %p1826_p7, %p1454_p6 }
  0x1d   : > { %s962_s24 = scalar_select %p1454_p6, [#allocation4], [#allocation13] }
  0x1e   : > { %s227_s26 = scalar_lea.vmem [#allocation5], %s843_s22  ;;  %s92_s21 = ssub.s32 %s1334_s13, %s1876_s15 }
  0x1f   : > { %s237_s27 = sshll.u32 %s227_s26, 4  ;;  %s1878_s24 = smov (!%p1826_p7, %s962_s24), [#allocation14]  ;;  %s1472_s27 = int_to_ptr.vmem [resolvable:$true] %s237_s27 }
  0x20   : > { %s43_s25 = ssub.s32 %s41_s16, %s42_s19  ;;  %s95_s16 = sadd.s32 1, %s1314_s9 }
  0x21   : > { %p46_p9 = scmp.eq.s32.totalorder %s43_s25, 0  ;;  %p93_p10 = scmp.eq.s32.totalorder %s92_s21, 0 }
  0x22   : > { %s963_s28 = scalar_select %p1454_p6, %s1334_s13, 0 }
  0x23   : > { %s1478_s29 = scalar_select %p46_p9, %s1326_s12, %s48_s17  }
  0x24   : > { %s1880_s28 = smov (!%p1826_p7, %s963_s28), 0  ;;  %p102_p11 = scmp.ne.s32.totalorder %s1314_s9, %s1310_s8 }
  0x25   : > { %1845 = sst [smem:[#allocation22_spill]] %s1478_s29  ;;  %s249_s19 = sand.u32 1, %s1314_s9  }
  0x26   : > { %s228_s30 = sld [smem:[%s1878_s24 + %s1880_s28]]  ;;  %s891_s22 = sshll.u32 %s1334_s13, 10 }
  0x27   : > { %s1492_s25 = scalar_select %p93_p10, %s1314_s9, %s95_s16  }
  0x28   : > { %p1496_p12 = por %p102_p11, %p56_p5  ;;  %s1847_s1 = sld [smem:[#allocation23_spill]] }
  0x29   : > { %s1505_s24 = sshll.u32 %s249_s19, 6  ;;  %s1507_s28 = scalar_lea.sflag [#allocation6], %s223_s20 }
  0x2a   : > { %p1108_p0 = pneg %p1466_p8 }
  0x2c   : > { %s890_s26 = sshll.u32 %s228_s30, 7 }
  0x2e   : > { %s1503_s12 = scalar_lea.hbm %s1847_s1, %s890_s26  ;;  %s1111_s16 = scalar_lea.hbm %s1847_s1, 256 }
  0x2f   : > { %s1106_s21 = scalar_lea.hbm %s1503_s12, 128  ;;  %p1112_p3 = scmp.lt.u32.totalorder %s1503_s12, %s1847_s1 }
  0x30   : > { %p1107_p13 = scmp.ne.s32.totalorder %s1503_s12, %s1106_s21  ;;  %p1113_p4 = scmp.lt.u32.totalorder %s1111_s16, %s1106_s21 }
  0x31   : > { %p1115_p6 = scmp.lt.u32.totalorder %s1106_s21, %s1503_s12 }
  0x32   : > { %p1109_p1 = pnand %p1108_p0, %p1107_p13  ;;  %p1114_p5 = por %p1113_p4, %p1112_p3 }
  0x34   : > { %p1110_p2 = pneg %p1109_p1  ;;  %p1116_p9 = por %p1115_p6, %p1114_p5 }
  0x36   : > { %p1117_p10 = pnand %p1116_p9, %p1110_p2 }
  0x38   : > { %1120 = shalt.err (!%p1117_p10)
}
  0x39   : > { %s1121_s20 = scalar_lea.vmem %s1472_s27, 128  ;;  %s1341_s19 = smov [#allocation5]  }
  0x3a   : > { %p1122_p11 = scmp.ne.s32.totalorder %s1472_s27, %s1121_s20  ;;  %s1126_s30 = sshll.u32 %s1341_s19, 4  ;;  %s1127_s30 = int_to_ptr.vmem [resolvable:$false] %s1126_s30 }
  0x3b   : > { %s1128_s29 = scalar_lea.vmem %s1127_s30, 256  ;;  %p1129_p7 = scmp.lt.s32.totalorder %s1472_s27, %s1127_s30 }
  0x3c   : > { %p1124_p13 = pnand %p1122_p11, %p1108_p0  ;;  %p1130_p3 = scmp.lt.s32.totalorder %s1128_s29, %s1121_s20 }
  0x3e   : > { %p1125_p1 = pneg %p1124_p13  ;;  %p1131_p4 = por %p1130_p3, %p1129_p7 }
  0x40   : > { %p1132_p5 = pnand %p1131_p4, %p1125_p1 }
  0x42   : > { %1135 = shalt.err (!%p1132_p5)
}
  0x43   : > { %s1827_s21 = smov 64   ;;  %s1829_s16 = smov 4  }
  0x44   : > { %985 = dma.hbm_to_vmem [thread:$0]  (!%p1466_p8), %s1503_s12, 128, %s1472_s27, %s1507_s28, %s1827_s21, %s1827_s21, %s1829_s16  }
  0x45   : > { %s1848_s3 = sld [smem:[#allocation24_spill]]  ;;  %s251_s19 = scalar_lea.vmem [#allocation10], %s1505_s24 }
  0x46   : > { %s258_s30 = sshll.u32 %s251_s19, 4  ;;  %p1849_p7 = scmp.lt.s32.totalorder %s1338_s14, 4  ;;  %s1554_s30 = int_to_ptr.vmem [resolvable:$true] %s258_s30 }
  0x48   : > { %p1550_p0 = pnand %p1849_p7, %p1496_p12 }
  0x4a   : > { %s1850_s23 = scalar_select %p1550_p0, 1, 0 }
  0x4b   : > { %s1543_s20 = scalar_lea.hbm %s1848_s3, %s891_s22  ;;  %p1833_p2 = pneg %p1550_p0 }
  0x4c   : > { %s1136_s12 = scalar_lea.hbm %s1543_s20, 1024  ;;  %s1141_s17 = scalar_lea.hbm %s1848_s3, 4096 }
  0x4d   : > { %p1137_p8 = scmp.ne.s32.totalorder %s1543_s20, %s1136_s12  ;;  %p1142_p12 = scmp.lt.u32.totalorder %s1543_s20, %s1848_s3 }
  0x4e   : > { %p1143_p10 = scmp.lt.u32.totalorder %s1141_s17, %s1136_s12  ;;  %p1145_p13 = scmp.lt.u32.totalorder %s1136_s12, %s1543_s20 }
  0x4f   : > { %p1139_p6 = pnand %p1833_p2, %p1137_p8 }
  0x50   : > { %p1144_p11 = por %p1143_p10, %p1142_p12 }
  0x51   : > { %p1140_p9 = pneg %p1139_p6 }
  0x52   : > { %p1146_p1 = por %p1145_p13, %p1144_p11 }
  0x54   : > { %p1147_p3 = pnand %p1146_p1, %p1140_p9 }
  0x56   : > { %1150 = shalt.err (!%p1147_p3)
}
  0x57   : > { %s1151_s19 = scalar_lea.vmem %s1554_s30, 1024  ;;  %s1344_s27 = smov [#allocation10]  }
  0x58   : > { %p1152_p4 = scmp.ne.s32.totalorder %s1554_s30, %s1151_s19  ;;  %s1156_s29 = sshll.u32 %s1344_s27, 4  ;;  %s1157_s29 = int_to_ptr.vmem [resolvable:$false] %s1156_s29 }
  0x59   : > { %s1158_s26 = scalar_lea.vmem %s1157_s29, 2048  ;;  %p1159_p8 = scmp.lt.s32.totalorder %s1554_s30, %s1157_s29 }
  0x5a   : > { %p1154_p5 = pnand %p1152_p4, %p1833_p2  ;;  %p1160_p6 = scmp.lt.s32.totalorder %s1158_s26, %s1151_s19 }
  0x5c   : > { %p1155_p7 = pneg %p1154_p5  ;;  %p1161_p12 = por %p1160_p6, %p1159_p8 }
  0x5e   : > { %p1162_p10 = pnand %p1161_p12, %p1155_p7 }
  0x60   : > { %1165 = shalt.err (!%p1162_p10)
}
  0x61   : > { %988 = dma.hbm_to_vmem [thread:$0]  (!%p1550_p0), %s1543_s20, 1024, %s1554_s30, %s1507_s28, %s1827_s21, %s1827_s21, %s1829_s16  }
  0x62   : > { %s1586_s12 = sadd.s32 4294967295, %s1338_s14   ;;  %p61_p9 = scmp.ne.s32.totalorder %s1322_s11, %s1318_s10 }
  0x63   : > { %p1832_p11 = scmp.eq.s32.totalorder %s1586_s12, 0  ;;  %p108_p13 = scmp.ne.s32.totalorder %s1310_s8, %s1306_s7 }
  0x64   : > { %p840_p1 = scmp.ge.s32.totalorder %s1338_s14, 1  ;;  %p197_p3 = scmp.lt.s32.totalorder %s1338_s14, 5 }
  0x65   : > { %p1597_p4 = por %p1832_p11, %p61_p9  ;;  %p1603_p5 = por %p108_p13, %p1832_p11 }
  0x66   : > { %p1607_p7 = pnand %p840_p1, %p197_p3  ;;  %s1345_s7 = smov [#allocation8]  }
  0x67   : > { %s1851_s17 = scalar_select %p1597_p4, 1, 0 }
  0x68   : > { %s1852_s20 = scalar_select %p1603_p5, 1, 0 }
  0x69   : > { %s1853_s30 = scalar_select %p1607_p7, 1, 0 }
  0x6a   : > { %p976_p8 = pneg %p1607_p7  ;;  %s209_s10 = sshll.u32 %s1345_s7, 4  ;;  %s210_s10 = int_to_ptr.vmem [resolvable:$true] %s209_s10 }
  0x6b   : > { %s272_s19 = scalar_lea.vmem [#allocation11], %s1505_s24  ;;  %s1625_s21 = scalar_lea.hbm %s1822_s4, %s891_s22 }
  0x6c   : > { %p1615_p6 = pnand %p976_p8, %p1832_p11  ;;  %s279_s27 = sshll.u32 %s272_s19, 4  ;;  %s1627_s27 = int_to_ptr.vmem [resolvable:$true] %s279_s27 }
  0x6d   : > { %s1166_s7 = scalar_lea.hbm %s1820_s2, 128 }
  0x6e   : > { %p1167_p12 = scmp.ne.s32.totalorder %s1820_s2, %s1166_s7  ;;  %p1168_p10 = pneg %p1615_p6 }
  0x6f   : > { %p1173_p1 = scmp.lt.u32.totalorder %s1166_s7, %s1820_s2 }
  0x70   : > { %p1169_p9 = pnand %p1168_p10, %p1167_p12 }
  0x72   : > { %p1170_p13 = pneg %p1169_p9 }
  0x74   : > { %p1175_p3 = pnand %p1173_p1, %p1170_p13 }
  0x76   : > { %1178 = shalt.err (!%p1175_p3)
}
  0x77   : > { %s1179_s22 = scalar_lea.vmem %s210_s10, 128  ;;  %p1187_p5 = scmp.lt.s32.totalorder %s210_s10, %s210_s10 }
  0x78   : > { %p1180_p8 = scmp.ne.s32.totalorder %s210_s10, %s1179_s22  ;;  %p1188_p4 = scmp.lt.s32.totalorder %s1179_s22, %s1179_s22 }
  0x7a   : > { %p1182_p11 = pnand %p1180_p8, %p1168_p10  ;;  %p1189_p7 = por %p1188_p4, %p1187_p5 }
  0x7c   : > { %p1183_p2 = pneg %p1182_p11 }
  0x7e   : > { %p1190_p0 = pnand %p1189_p7, %p1183_p2 }
  0x80   : > { %1193 = shalt.err (!%p1190_p0)
}
  0x81   : > { %s1855_s1 = smov 4   ;;  %s1856_s3 = smov 64  }
  0x82   : > { %979 = dma.hbm_to_vmem [thread:$0]  (!%p1615_p6), %s1820_s2, 128, %s210_s10, [#allocation9], %s1856_s3, %s1856_s3, %s1855_s1  }
  0x83   : > { %s1194_s29 = scalar_lea.hbm %s1625_s21, 1024  ;;  %p1857_p12 = scmp.ne.s32.totalorder %s1850_s23, 0 }
  0x84   : > { %p1195_p11 = scmp.ne.s32.totalorder %s1625_s21, %s1194_s29  ;;  %s1199_s7 = scalar_lea.hbm %s1822_s4, 4096 }
  0x85   : > { %p1858_p4 = pneg %p1857_p12  ;;  %p1200_p5 = scmp.lt.u32.totalorder %s1625_s21, %s1822_s4 }
  0x86   : > { %p1201_p7 = scmp.lt.u32.totalorder %s1199_s7, %s1194_s29  ;;  %p1203_p9 = scmp.lt.u32.totalorder %s1194_s29, %s1625_s21 }
  0x87   : > { %p1197_p2 = pnand %p1195_p11, %p1858_p4 }
  0x88   : > { %p1202_p10 = por %p1201_p7, %p1200_p5 }
  0x89   : > { %p1198_p0 = pneg %p1197_p2 }
  0x8a   : > { %p1204_p13 = por %p1203_p9, %p1202_p10 }
  0x8c   : > { %p1205_p1 = pnand %p1204_p13, %p1198_p0 }
  0x8e   : > { %1208 = shalt.err (!%p1205_p1)
}
  0x8f   : > { %s1209_s10 = scalar_lea.vmem %s1627_s27, 1024  ;;  %p1859_p3 = pmov %p1858_p4 }
  0x90   : > { %p1210_p6 = scmp.ne.s32.totalorder %s1627_s27, %s1209_s10  ;;  %s1346_s22 = smov [#allocation11]  }
  0x91   : > { %s1214_s15 = sshll.u32 %s1346_s22, 4  ;;  %s1215_s15 = int_to_ptr.vmem [resolvable:$false] %s1214_s15 }
  0x92   : > { %p1212_p8 = pnand %p1210_p6, %p1859_p3  ;;  %s1216_s16 = scalar_lea.vmem %s1215_s15, 2048 }
  0x93   : > { %p1217_p4 = scmp.lt.s32.totalorder %s1627_s27, %s1215_s15  ;;  %p1218_p2 = scmp.lt.s32.totalorder %s1216_s16, %s1209_s10 }
  0x94   : > { %p1213_p11 = pneg %p1212_p8 }
  0x95   : > { %p1219_p5 = por %p1218_p2, %p1217_p4 }
  0x97   : > { %p1220_p7 = pnand %p1219_p5, %p1213_p11 }
  0x99   : > { %1223 = shalt.err (!%p1220_p7)
}
  0x9a   : > { %991 = dma.hbm_to_vmem [thread:$0]  (!%p1857_p12), %s1625_s21, 1024, %s1627_s27, %s1507_s28, %s1856_s3, %s1856_s3, %s1855_s1  }
  0x9b   : > { %p1860_p0 = scmp.ne.s32.totalorder %s1853_s30, 0 }
  0x9c   : > { %s299_s29 = sand.u32 (!%p1860_p0), 1, %s1586_s12   ;;  %s301_s26 = sand.u32 (!%p1860_p0), 1, %s1322_s11  }
  0x9d   : > { %297 = sbr.rel (%p1860_p0) target bundleno = 653 (0x28d), region = 40  ;;  %s1679_s18 = sshll.u32 (!%p1860_p0), %s301_s26, 3 }
  0x9e   : > { %s300_s7 = scalar_lea.sflag (!%p1860_p0), [#allocation6], %s299_s29  ;;  %s303_s23 = scalar_lea.vmem (!%p1860_p0), [#allocation5], %s1679_s18 }
  0x9f   : > { %p1861_p10 = scmp.ne.s32.totalorder (!%p1860_p0), %s1851_s17, 0 }
  0xa4   : > { %1289 = dma.done.wait (%p1861_p10), %s300_s7, 128  }
  0xa5   : > { %1291 = vsyncadd (%p1861_p10), %s300_s7, 4294967168  ;;  %p1862_p12 = scmp.eq.s32.totalorder %s1586_s12, 0 }
  0xa7   : > { %1293 = dma.done.wait (%p1862_p12), [#allocation9], 128   ;;  %p1863_p9 = pmov %p1862_p12 }
  0xa8   : > { %s314_s28 = sand.u32 1, %s1310_s8   ;;  %p1864_p13 = scmp.ne.s32.totalorder %s1852_s20, 0 }
  0xa9   : > { %1295 = vsyncadd (%p1863_p9), [#allocation9], 4294967168  ;;  %s855_s21 = sshll.u32 %s314_s28, 6 }
  0xaa   : > { %s1691_s30 = scalar_lea.vmem [#allocation10], %s855_s21 }
  0xab   : > { %1297 = dma.done.wait (%p1864_p13), %s300_s7, 2048  }
  0xac   : > { %1299 = vsyncadd (%p1864_p13), %s300_s7, 4294965248  ;;  %p362_p1 = scmp.lt.s32.totalorder %s1330_s0, 3  ;;  %p367_p6 = scmp.eq.s32.totalorder %s1330_s0, 0 }
  0xad   : > { %s1708_s24 = scalar_lea.vmem [#allocation11], %s855_s21  ;;  %v1078_v0 = vld [vmem:[#allocation8] sm:$0xff] (%p367_p6)  }
  0xae   : > { %s1702_s17 = scalar_select %p362_p1, %s1330_s0, 3 }
  0xaf   : > { %372 = sbr.rel (!%p367_p6) target bundleno = 182 (0xb6), region = 60  ;;  %381 = vst [vmem:[#allocation2] sm:$0xff] (%p367_p6), %v1078_v0 }
  0xb0   : > { %s364_s3 = scalar_lea.vmem %s1823_s5, %s1702_s17 }
  0xb6 PF: > { %p382_p3 = scmp.lt.s32.totalorder %s1330_s0, 0  ;;  %s383_s20 = ssub.s32 0, %s1330_s0  ;;  %v1347_v1 = vmov 0.0   ;;  %vm1348_vm0 = vmmov 0   ;;  %v1080_v2 = vld [vmem:[%s1708_s24] sm:$0xff]   ;;  %v1082_v3 = vld [vmem:[%s1708_s24 + $0x8] sm:$0xff]  }
  0xb7   : > { %914 = vmatprep.subr.bf16.mxu0 %v1347_v1  ;;  %s859_s19 = smin.u32 %s1330_s0, %s383_s20  ;;  %916 = vmatprep.mubr.msk.bf16.mxu0 %vm1348_vm0, %v1347_v1  ;;  %v1084_v4 = vld [vmem:[%s1708_s24 + $0x10] sm:$0xff]   ;;  %v1086_v5 = vld [vmem:[%s1708_s24 + $0x18] sm:$0xff]   ;;  %vm417_vm1 = vcmask 130048   ;;  %v1081_v8 = vld [vmem:[%s1691_s30] sm:$0xff]   ;;  %s1349_s0 = smov [#allocation12]  }
  0xb8   : > { %s385_s10 = sand.u32 1, %s859_s19   ;;  %920 = vmatprep.subr.bf16.mxu1 %v1347_v1  ;;  %936 = vmatprep.mubr.msk.bf16.mxu1 %vm1348_vm0, %v1347_v1  ;;  %v1079_v6 = vld [vmem:[%s303_s23] sm:$0xff]   ;;  %v1088_v9 = vld [vmem:[%s1708_s24 + $0x20] sm:$0xff]   ;;  %v1087_v14 = vld [vmem:[%s1691_s30 + $0x18] sm:$0xff]   ;;  %s707_s1 = sshll.u32 %s1349_s0, 4  ;;  %s708_s1 = int_to_ptr.vmem [resolvable:$true] %s707_s1 }
  0xb9   : > { %s386_s22 = ssub.s32 0, %s385_s10  ;;  %921 = vmatpush3.bf16.msra.mxu1 %v1080_v2  ;;  %v1083_v10 = vld [vmem:[%s1691_s30 + $0x8] sm:$0xff]   ;;  %v1085_v12 = vld [vmem:[%s1691_s30 + $0x10] sm:$0xff]   ;;  %v1094_v15 = vld [vmem:[%s1708_s24 + $0x38] sm:$0xff]   ;;  %p995_p11 = scmp.eq.s32.totalorder %s1586_s12, 3 }
  0xba   : > { %s1882_s22 = smov (!%p382_p3, %s386_s22), %s385_s10  ;;  %922 = vmatprep.subr.bf16.mxu1 %v1347_v1  ;;  %v1090_v11 = vld [vmem:[%s1708_s24 + $0x28] sm:$0xff]   ;;  %v1092_v13 = vld [vmem:[%s1708_s24 + $0x30] sm:$0xff]   ;;  %v1089_v16 = vld [vmem:[%s1691_s30 + $0x20] sm:$0xff]   ;;  %s1224_s17 = scalar_lea.vmem %s708_s1, 256 }
  0xbb   : > { %p861_p8 = scmp.lt.s32.totalorder %s1882_s22, 0  ;;  %s392_s15 = sadd.s32 2, %s1882_s22  ;;  %v1091_v17 = vld [vmem:[%s1691_s30 + $0x28] sm:$0xff]   ;;  %v1093_v18 = vld [vmem:[%s1691_s30 + $0x30] sm:$0xff]   ;;  %v1095_v19 = vld [vmem:[%s1691_s30 + $0x38] sm:$0xff]  }
  0xbc   : > { %s685_s23 = scalar_select %p362_p1, 1, 0  ;;  %v884_v30 = vld [vmem:[%s364_s3] ss:$0 sm:$0xff] }
  0xbd   : > { %s1884_s15 = smov (!%p861_p8, %s392_s15), %s1882_s22  ;;  %923 = vmatpush3.bf16.msra.mxu1 %v1082_v3  ;;  %p1225_p4 = scmp.ne.s32.totalorder %s708_s1, %s1224_s17 }
  0xbe   : > { %924 = vmatprep.subr.bf16.mxu1 %v1347_v1  ;;  %s862_s16 = sshll.u32 %s1884_s15, 4  ;;  %s397_s18 = ssub.s32 1, %s1884_s15  ;;  %v686_v32 = vstv %s685_s23 }
  0xbf   : > { %s400_s29 = sshra.s32 %s862_s16, 4  ;;  %s863_s28 = sshll.u32 %s397_s18, 4  ;;  %vm687_vm2 = vcmp.eq.s32.totalorder %v686_v32, 1 }
  0xc0   : > { %s864_s26 = sshll.u32 %s400_s29, 3  ;;  %s691_s30 = sshra.s32 %s863_s28, 4 }
  0xc1   : > { %925 = vmatpush3.bf16.msra.mxu1 %v1084_v4  ;;  %s403_s7 = scalar_lea.vmem [#allocation2], %s864_s26  ;;  %s1765_s24 = sshll.u32 %s691_s30, 3 }
  0xc2   : > { %926 = vmatprep.subr.bf16.mxu1 %v1347_v1  ;;  %v404_v7 = vld [vmem:[%s403_s7] sm:$0xff]  ;;  %p1226_p2 = pnand %p1225_p4, %p995_p11  ;;  %p1231_p7 = scmp.lt.s32.totalorder %s708_s1, %s708_s1 }
  0xc3   : > { %915 = vmatpush3.bf16.msra.mxu0 %v404_v7  ;;  %p1232_p0 = scmp.lt.s32.totalorder %s1224_s17, %s1224_s17 }
  0xc4   : > { %940 = vmatprep.subr.bf16.mxu0 %v1347_v1  ;;  %p1227_p5 = pneg %p1226_p2 }
  0xc5   : > { %927 = vmatpush3.bf16.msra.mxu1 %v1086_v5  ;;  %p1233_p10 = por %p1232_p0, %p1231_p7 }
  0xc6   : > { %928 = vmatprep.subr.bf16.mxu1 %v1347_v1  ;;  %917 = vmatmul.mubr.msk.bf16.vlgmr.msra.gmra.mrb[0].mxu0 %vm417_vm1, %v1079_v6 }
  0xc7   : > { %941 = vmatpush3.bf16.msra.mxu0 %v1081_v8  ;;  %956 = vmatprep.mubr.msk.bf16.mxu0 %vm1348_vm0, %v1347_v1  ;;  %p1234_p12 = pnand %p1233_p10, %p1227_p5 }
  0xc8   : > { %942 = vmatprep.subr.bf16.mxu0 %v1347_v1 }
  0xc9   : > { %929 = vmatpush3.bf16.msra.mxu1 %v1088_v9 }
  0xca   : > { %930 = vmatprep.subr.bf16.mxu1 %v1347_v1 }
  0xcb   : > { %943 = vmatpush3.bf16.msra.mxu0 %v1083_v10 }
  0xcc   : > { %944 = vmatprep.subr.bf16.mxu0 %v1347_v1 }
  0xcd   : > { %931 = vmatpush3.bf16.msra.mxu1 %v1090_v11 }
  0xce   : > { %932 = vmatprep.subr.bf16.mxu1 %v1347_v1 }
  0xcf   : > { %945 = vmatpush3.bf16.msra.mxu0 %v1085_v12 }
  0xd0   : > { %946 = vmatprep.subr.bf16.mxu0 %v1347_v1 }
  0xd1   : > { %933 = vmatpush3.bf16.msra.mxu1 %v1092_v13 }
  0xd2   : > { %934 = vmatprep.subr.bf16.mxu1 %v1347_v1 }
  0xd3   : > { %947 = vmatpush3.bf16.msra.mxu0 %v1087_v14 }
  0xd4   : > { %948 = vmatprep.subr.bf16.mxu0 %v1347_v1 }
  0xd5   : > { %935 = vmatpush3.bf16.msra.mxu1 %v1094_v15 }
  0xd7   : > { %949 = vmatpush3.bf16.msra.mxu0 %v1089_v16 }
  0xd8   : > { %937 = vmatmul.mubr.bf16.vlgmr.msra.gmra.mrb[0].mxu1 %v404_v7  ;;  %950 = vmatprep.subr.bf16.mxu0 %v1347_v1 }
  0xdb   : > { %951 = vmatpush3.bf16.msra.mxu0 %v1091_v17 }
  0xdc   : > { %952 = vmatprep.subr.bf16.mxu0 %v1347_v1 }
  0xdf   : > { %953 = vmatpush3.bf16.msra.mxu0 %v1093_v18 }
  0xe0   : > { %954 = vmatprep.subr.bf16.mxu0 %v1347_v1 }
  0xe3   : > { %955 = vmatpush3.bf16.msra.mxu0 %v1095_v19 }
 0x199   : > { %v455_v20 = vpop.f32.mrb[0].mxu0 }
 0x19a   : > { %v918_v21 = vpop.f32.mrb[1].mxu0 }
 0x19b   : > { %v458_v22 = vpop.f32.mrb[2].mxu0 }
 0x19c   : > { %v462_v23 = vpack.c.bf16 %v458_v22, %v455_v20  ;;  %v919_v24 = vpop.f32.mrb[3].mxu0 }
 0x19e   : > { %957 = vmatmul.mubr.bf16.vlgmr.msra.gmra.mrb[4].mxu0 %v462_v23 }
 0x1ab   : > { %v577_v25 = vpop.f32.mrb[0].mxu1 }
 0x1ac   : > { %v938_v26 = vpop.f32.mrb[1].mxu1 }
 0x1ad   : > { %v580_v27 = vpop.f32.mrb[2].mxu1 }
 0x1ae   : > { %v939_v28 = vpop.f32.mrb[3].mxu1 }
 0x271   : > { %v666_v29 = vpop.f32.mrb[4].mxu0 }
 0x272   : > { %v667_v31 = vadd.f32 %v666_v29, %v577_v25  ;;  %v958_v33 = vpop.f32.mrb[5].mxu0 }
 0x273   : > { %v669_v34 = vpop.f32.mrb[6].mxu0 }
 0x274   : > { %v680_v35 = vadd.f32 %v884_v30, %v667_v31  ;;  %v670_v36 = vadd.f32 %v669_v34, %v580_v27  ;;  %v959_v37 = vpop.f32.mrb[7].mxu0 }
 0x276   : > { %v683_v38 = vmax.f32 %v680_v35, 0.0  ;;  %v681_v39 = vadd.f32 %v884_v30, %v670_v36 }
 0x278   : > { %v688_v40 = vsel %vm687_vm2, %v683_v38, %v680_v35  ;;  %v684_v41 = vmax.f32 %v681_v39, 0.0 }
 0x279   : > { %696 = vst [vmem:[#allocation12] sm:$0xff] %v688_v40 }
 0x27a   : > { %v689_v42 = vsel %vm687_vm2, %v684_v41, %v681_v39 }
 0x27b   : > { %v690_v43 = vpack.c.bf16 %v689_v42, %v688_v40  ;;  %697 = vst [vmem:[#allocation12 + $0x8] sm:$0xff] %v689_v42 }
 0x27c   : > { %1237 = shalt.err (!%p1234_p12)
}
 0x27d   : > { %s1238_s19 = scalar_lea.hbm %s1824_s6, 256 }
 0x27e   : > { %p1239_p9 = scmp.ne.s32.totalorder %s1824_s6, %s1238_s19  ;;  %p1244_p6 = scmp.lt.u32.totalorder %s1238_s19, %s1824_s6 }
 0x280   : > { %p1240_p13 = pnand %p1239_p9, %p995_p11 }
 0x282   : > { %p1241_p1 = pneg %p1240_p13 }
 0x284   : > { %p1246_p3 = pnand %p1244_p6, %p1241_p1 }
 0x286   : > { %1249 = shalt.err (!%p1246_p3)
}
 0x287   : > { %s1350_s29 = smov 128   ;;  %s1351_s26 = smov 8  }
 0x288   : > { %973 = dma.vmem_to_hbm [thread:$0]  (%p995_p11), %s708_s1, 256, %s1824_s6, [#allocation7], %s1350_s29, %s1350_s29, %s1351_s26  }
 0x289   : > { %s694_s23 = scalar_lea.vmem [#allocation2], %s1765_s24 }
 0x28a   : > { %695 = vst [vmem:[%s694_s23] sm:$0xff] %v690_v43 }
 0x28b   : > { %1301 = dma.done.wait (%p995_p11), [#allocation7], 256  }
 0x28c   : > { %1303 = vsyncadd (%p995_p11), [#allocation7], 4294967040 }
 0x28d PF: > { %s25_s14 = sadd.s32 1, %s1338_s14   ;;  %s1865_s28 = sld [smem:[#allocation20_spill]] }
 0x28e   : > { %p22_p8 = scmp.ge.s32.totalorder %s25_s14, 6   ;;  %s1866_s12 = sld [smem:[#allocation22_spill]] }
 0x28f   : > { %s1867_s21 = sld [smem:[#allocation21_spill]]  ;;  %s1868_s7 = smov %s1310_s8 }
 0x290   : > { %s1869_s8 = smov %s1314_s9  ;;  %s1870_s9 = smov %s1492_s25 }
 0x291   : > { %s1871_s10 = smov %s1322_s11  ;;  %s1873_s0 = smov %s1334_s13 }
 0x292   :  { %24 = sbr.rel (!%p22_p8) target bundleno = 21 (0x15), region = 114 }
 0x293   : > { %s1872_s11 = smov %s1865_s28 }
 0x295   : > { %s1874_s13 = smov %s1867_s21 }
 0x299   :  { %723 = vsyncpa [#allocation6], 1 }
 0x29a   :  { %725 = vsyncpa [#allocation6 + $0x1], 1 }
 0x29b   :  { %726 = vsyncpa [#allocation9], 1 }
 0x29c   :  { %727 = vsyncpa [#allocation7], 1 }
 0x29d   :  { %729 = vsyncpa [#allocation7 + $0x1], 1 }

</bundles_post_ra>
